<compile_context>
chip_gen: v7x
topology: tpu7x:2x2x1
jax: 0.10.0
libtpu: 0.0.40
codegen_flags: <defaults>
</compile_context>

<pallas_src>
import functools

import jax
import jax.numpy as jnp
from jax import lax
from jax.experimental import pallas as pl
from jax.experimental.pallas import tpu as pltpu


def _gradient_loss_kernel(x_ref, y_ref, out_ref, xrow_ref, yrow_ref, *, H, W):
    """Per-image partial sums of the squared gradient-loss error.

    x_ref, y_ref      : (B, 3, H, W) raw NCHW input blocks (B images per step)
    out_ref           : (B, 1, 1)    per-image sum of squared errors
    xrow_ref, yrow_ref: (B, H+2, W)  f32 scratch holding row-padded channel sums
    """
    B = out_ref.shape[0]
    zrow = jnp.zeros((B, 1, W), jnp.float32)

    def vertical_pass(src_ref, pad_ref):
        # Fused channel sum (the (1,3,3,3) conv weight repeats the same 3x3
        # filter over the input channels), written into a row-padded scratch.
        xv = src_ref[...]                                   # (B, 3, H, W)
        s = (xv[:, 0] + xv[:, 1] + xv[:, 2]).astype(jnp.float32)
        pad_ref[:, 0:1, :] = zrow                           # top zero row
        pad_ref[:, 1:H + 1, :] = s                          # interior (lane offset 0)
        pad_ref[:, H + 1:H + 2, :] = zrow                   # bottom zero row
        p = pad_ref[...]                                    # (B, H+2, W)
        c = p[:, 1:H + 1, :]
        # Vertical Sobel taps [1, 2, 1]: adds only.
        return p[:, 0:H, :] + c + c + p[:, 2:H + 2, :]      # (B, H, W)

    vx = vertical_pass(x_ref, xrow_ref)
    vy = vertical_pass(y_ref, yrow_ref)

    def piece_sse(gx, gy):
        d = jnp.abs(gx) - jnp.abs(gy)
        d = d * d
        # lane reduce, then sublane reduce -> (B, 1, 1)
        return jnp.sum(jnp.sum(d, axis=2, keepdims=True), axis=1, keepdims=True)

    # Horizontal Sobel taps [1, 0, -1]; zero column padding handled analytically:
    #   interior output cols 1..W-2 : v[:, :, j-1] - v[:, :, j+1]
    #   output col 0                : -v[:, :, 1]      (sign dropped by |.|)
    #   output col W-1              :  v[:, :, W-2]
    sse = piece_sse(vx[:, :, 0:W - 2] - vx[:, :, 2:W],
                    vy[:, :, 0:W - 2] - vy[:, :, 2:W])
    sse = sse + piece_sse(vx[:, :, 1:2], vy[:, :, 1:2])
    sse = sse + piece_sse(vx[:, :, W - 2:W - 1], vy[:, :, W - 2:W - 1])
    out_ref[...] = sse


def _images_per_block(N, H, W, budget_bytes=8 * 1024 * 1024):
    """Largest divisor of N whose per-grid-step VMEM footprint fits the budget."""
    per_img = 4 * (2 * 2 * 3 * H * W      # 2 inputs x 2 pipeline buffers x (3,H,W)
                   + 2 * (H + 2) * W      # 2 row-padded scratches
                   + 8 * H * W)           # headroom for compiler temporaries
    best = 1
    for b in range(1, N + 1):
        if N % b == 0 and b * per_img <= budget_bytes:
            best = b
    return best


@jax.jit
def gradient_loss(X, Y):
    """X, Y: (N, 3, H, W) NCHW. Returns the scalar MSE gradient loss."""
    N, C, H, W = X.shape
    assert C == 3, "gradient_loss expects 3 input channels"
    assert W >= 3, "Sobel gradient loss expects W >= 3"

    X = X.astype(jnp.float32)
    Y = Y.astype(jnp.float32)

    B = _images_per_block(N, H, W)
    kernel = functools.partial(_gradient_loss_kernel, H=H, W=W)

    partials = pl.pallas_call(
        kernel,
        out_shape=jax.ShapeDtypeStruct((N, 1, 1), jnp.float32),
        grid=(N // B,),
        in_specs=[
            pl.BlockSpec((B, 3, H, W), lambda n: (n, 0, 0, 0)),
            pl.BlockSpec((B, 3, H, W), lambda n: (n, 0, 0, 0)),
        ],
        out_specs=pl.BlockSpec((B, 1, 1), lambda n: (n, 0, 0)),
        scratch_shapes=[
            pltpu.VMEM((B, H + 2, W), jnp.float32),
            pltpu.VMEM((B, H + 2, W), jnp.float32),
        ],
        compiler_params=pltpu.CompilerParams(
            dimension_semantics=("parallel",),
            vmem_limit_bytes=32 * 1024 * 1024,
        ),
    )(X, Y)

    # Mean over the (N, 1, H, W) conv-output elements (F.mse_loss size_average=True).
    return jnp.sum(partials) / jnp.float32(N * 1 * H * W)


def _reference_loss(X, Y):
    """Pure-JAX mirror of the PyTorch forward (all four convs) for verification."""
    sobel_x = jnp.array([[1., 0., -1.], [2., 0., -2.], [1., 0., -1.]], jnp.float32)
    sobel_y = jnp.array([[1., 2., 1.], [0., 0., 0.], [-1., -2., -1.]], jnp.float32)
    wx = jnp.broadcast_to(sobel_x, (1, 3, 3, 3))
    wy = jnp.broadcast_to(sobel_y, (1, 3, 3, 3))

    def conv(img, w):
        return lax.conv_general_dilated(
            img, w, window_strides=(1, 1), padding=((1, 1), (1, 1)),
            dimension_numbers=("NCHW", "OIHW", "NCHW"))

    X_hx = conv(X, wx)
    X_hy = conv(Y, wy)
    G_X = jnp.abs(X_hx) + jnp.abs(X_hy)
    Y_hx = conv(Y, wx)
    Y_hy = conv(Y, wy)
    G_Y = jnp.abs(Y_hx) + jnp.abs(Y_hy)
    return jnp.mean((G_X - G_Y) ** 2)


if __name__ == "__main__":
    key = jax.random.PRNGKey(0)
    kx, ky = jax.random.split(key)
    X = jax.random.normal(kx, (2, 3, 16, 16), dtype=jnp.float32)
    Y = jax.random.normal(ky, (2, 3, 16, 16), dtype=jnp.float32)

    loss = jax.block_until_ready(gradient_loss(X, Y))
    ref = jax.block_until_ready(_reference_loss(X, Y))

    assert jnp.allclose(loss, ref, rtol=1e-5, atol=1e-5), (loss, ref)
    print("KERNEL_OK")
</pallas_src>

<mosaic_0001>
module attributes {stable_mosaic.version = 11 : i64} {
  func.func @_gradient_loss_kernel(%arg0: i32, %arg1: memref<2x3x16x16xf32, #tpu.memory_space<vmem>>, %arg2: memref<2x3x16x16xf32, #tpu.memory_space<vmem>>, %arg3: memref<2x1x1xf32, #tpu.memory_space<vmem>>, %arg4: memref<2x18x16xf32, #tpu.memory_space<vmem>>, %arg5: memref<2x18x16xf32, #tpu.memory_space<vmem>>) attributes {dimension_semantics = [#tpu.dimension_semantics<parallel>], iteration_bounds = array<i64: 1>, scalar_prefetch = 0 : i64, scratch_operands = 2 : i64, tpu.core_type = #tpu.core_type<tc>, window_params = [{transform_indices = @transform_0, window_bounds = array<i64: 2, 3, 16, 16>}, {transform_indices = @transform_1, window_bounds = array<i64: 2, 3, 16, 16>}, {transform_indices = @transform_2, window_bounds = array<i64: 2, 1, 1>}]} {
    %cst = arith.constant 0.000000e+00 : f32
    %0 = vector.broadcast %cst : f32 to vector<2x1x16xf32>
    %c0 = arith.constant 0 : index
    %c0_0 = arith.constant 0 : index
    %c0_1 = arith.constant 0 : index
    %c0_2 = arith.constant 0 : index
    %1 = vector.load %arg1[%c0, %c0_0, %c0_1, %c0_2] : memref<2x3x16x16xf32, #tpu.memory_space<vmem>>, vector<2x3x16x16xf32>
    %2 = vector.extract_strided_slice %1 {offsets = [0, 0, 0, 0], sizes = [2, 1, 16, 16], strides = [1, 1, 1, 1]} : vector<2x3x16x16xf32> to vector<2x1x16x16xf32>
    %3 = vector.shape_cast %2 : vector<2x1x16x16xf32> to vector<2x16x16xf32>
    %4 = vector.extract_strided_slice %1 {offsets = [0, 1, 0, 0], sizes = [2, 1, 16, 16], strides = [1, 1, 1, 1]} : vector<2x3x16x16xf32> to vector<2x1x16x16xf32>
    %5 = vector.shape_cast %4 : vector<2x1x16x16xf32> to vector<2x16x16xf32>
    %6 = arith.addf %3, %5 : vector<2x16x16xf32>
    %7 = vector.extract_strided_slice %1 {offsets = [0, 2, 0, 0], sizes = [2, 1, 16, 16], strides = [1, 1, 1, 1]} : vector<2x3x16x16xf32> to vector<2x1x16x16xf32>
    %8 = vector.shape_cast %7 : vector<2x1x16x16xf32> to vector<2x16x16xf32>
    %9 = arith.addf %6, %8 : vector<2x16x16xf32>
    %c0_3 = arith.constant 0 : index
    %c0_4 = arith.constant 0 : index
    %c0_5 = arith.constant 0 : index
    %10 = vector.load %arg4[%c0_3, %c0_4, %c0_5] : memref<2x18x16xf32, #tpu.memory_space<vmem>>, vector<2x1x16xf32>
    tpu.vector_store %arg4[%c0_3, %c0_4, %c0_5], %0 {strides = array<i32>} : memref<2x18x16xf32, #tpu.memory_space<vmem>>, vector<2x1x16xf32>,
    %c0_6 = arith.constant 0 : index
    %c1 = arith.constant 1 : index
    %c0_7 = arith.constant 0 : index
    %11 = vector.load %arg4[%c0_6, %c1, %c0_7] : memref<2x18x16xf32, #tpu.memory_space<vmem>>, vector<2x16x16xf32>
    tpu.vector_store %arg4[%c0_6, %c1, %c0_7], %9 {strides = array<i32>} : memref<2x18x16xf32, #tpu.memory_space<vmem>>, vector<2x16x16xf32>,
    %c0_8 = arith.constant 0 : index
    %c17 = arith.constant 17 : index
    %c0_9 = arith.constant 0 : index
    %12 = vector.load %arg4[%c0_8, %c17, %c0_9] : memref<2x18x16xf32, #tpu.memory_space<vmem>>, vector<2x1x16xf32>
    tpu.vector_store %arg4[%c0_8, %c17, %c0_9], %0 {strides = array<i32>} : memref<2x18x16xf32, #tpu.memory_space<vmem>>, vector<2x1x16xf32>,
    %c0_10 = arith.constant 0 : index
    %c0_11 = arith.constant 0 : index
    %c0_12 = arith.constant 0 : index
    %13 = vector.load %arg4[%c0_10, %c0_11, %c0_12] : memref<2x18x16xf32, #tpu.memory_space<vmem>>, vector<2x18x16xf32>
    %14 = vector.extract_strided_slice %13 {offsets = [0, 1, 0], sizes = [2, 16, 16], strides = [1, 1, 1]} : vector<2x18x16xf32> to vector<2x16x16xf32>
    %15 = vector.extract_strided_slice %13 {offsets = [0, 0, 0], sizes = [2, 16, 16], strides = [1, 1, 1]} : vector<2x18x16xf32> to vector<2x16x16xf32>
    %16 = arith.addf %15, %14 : vector<2x16x16xf32>
    %17 = arith.addf %16, %14 : vector<2x16x16xf32>
    %18 = vector.extract_strided_slice %13 {offsets = [0, 2, 0], sizes = [2, 16, 16], strides = [1, 1, 1]} : vector<2x18x16xf32> to vector<2x16x16xf32>
    %19 = arith.addf %17, %18 : vector<2x16x16xf32>
    %c0_13 = arith.constant 0 : index
    %c0_14 = arith.constant 0 : index
    %c0_15 = arith.constant 0 : index
    %c0_16 = arith.constant 0 : index
    %20 = vector.load %arg2[%c0_13, %c0_14, %c0_15, %c0_16] : memref<2x3x16x16xf32, #tpu.memory_space<vmem>>, vector<2x3x16x16xf32>
    %21 = vector.extract_strided_slice %20 {offsets = [0, 0, 0, 0], sizes = [2, 1, 16, 16], strides = [1, 1, 1, 1]} : vector<2x3x16x16xf32> to vector<2x1x16x16xf32>
    %22 = vector.shape_cast %21 : vector<2x1x16x16xf32> to vector<2x16x16xf32>
    %23 = vector.extract_strided_slice %20 {offsets = [0, 1, 0, 0], sizes = [2, 1, 16, 16], strides = [1, 1, 1, 1]} : vector<2x3x16x16xf32> to vector<2x1x16x16xf32>
    %24 = vector.shape_cast %23 : vector<2x1x16x16xf32> to vector<2x16x16xf32>
    %25 = arith.addf %22, %24 : vector<2x16x16xf32>
    %26 = vector.extract_strided_slice %20 {offsets = [0, 2, 0, 0], sizes = [2, 1, 16, 16], strides = [1, 1, 1, 1]} : vector<2x3x16x16xf32> to vector<2x1x16x16xf32>
    %27 = vector.shape_cast %26 : vector<2x1x16x16xf32> to vector<2x16x16xf32>
    %28 = arith.addf %25, %27 : vector<2x16x16xf32>
    %c0_17 = arith.constant 0 : index
    %c0_18 = arith.constant 0 : index
    %c0_19 = arith.constant 0 : index
    %29 = vector.load %arg5[%c0_17, %c0_18, %c0_19] : memref<2x18x16xf32, #tpu.memory_space<vmem>>, vector<2x1x16xf32>
    tpu.vector_store %arg5[%c0_17, %c0_18, %c0_19], %0 {strides = array<i32>} : memref<2x18x16xf32, #tpu.memory_space<vmem>>, vector<2x1x16xf32>,
    %c0_20 = arith.constant 0 : index
    %c1_21 = arith.constant 1 : index
    %c0_22 = arith.constant 0 : index
    %30 = vector.load %arg5[%c0_20, %c1_21, %c0_22] : memref<2x18x16xf32, #tpu.memory_space<vmem>>, vector<2x16x16xf32>
    tpu.vector_store %arg5[%c0_20, %c1_21, %c0_22], %28 {strides = array<i32>} : memref<2x18x16xf32, #tpu.memory_space<vmem>>, vector<2x16x16xf32>,
    %c0_23 = arith.constant 0 : index
    %c17_24 = arith.constant 17 : index
    %c0_25 = arith.constant 0 : index
    %31 = vector.load %arg5[%c0_23, %c17_24, %c0_25] : memref<2x18x16xf32, #tpu.memory_space<vmem>>, vector<2x1x16xf32>
    tpu.vector_store %arg5[%c0_23, %c17_24, %c0_25], %0 {strides = array<i32>} : memref<2x18x16xf32, #tpu.memory_space<vmem>>, vector<2x1x16xf32>,
    %c0_26 = arith.constant 0 : index
    %c0_27 = arith.constant 0 : index
    %c0_28 = arith.constant 0 : index
    %32 = vector.load %arg5[%c0_26, %c0_27, %c0_28] : memref<2x18x16xf32, #tpu.memory_space<vmem>>, vector<2x18x16xf32>
    %33 = vector.extract_strided_slice %32 {offsets = [0, 1, 0], sizes = [2, 16, 16], strides = [1, 1, 1]} : vector<2x18x16xf32> to vector<2x16x16xf32>
    %34 = vector.extract_strided_slice %32 {offsets = [0, 0, 0], sizes = [2, 16, 16], strides = [1, 1, 1]} : vector<2x18x16xf32> to vector<2x16x16xf32>
    %35 = arith.addf %34, %33 : vector<2x16x16xf32>
    %36 = arith.addf %35, %33 : vector<2x16x16xf32>
    %37 = vector.extract_strided_slice %32 {offsets = [0, 2, 0], sizes = [2, 16, 16], strides = [1, 1, 1]} : vector<2x18x16xf32> to vector<2x16x16xf32>
    %38 = arith.addf %36, %37 : vector<2x16x16xf32>
    %39 = vector.extract_strided_slice %19 {offsets = [0, 0, 0], sizes = [2, 16, 14], strides = [1, 1, 1]} : vector<2x16x16xf32> to vector<2x16x14xf32>
    %40 = vector.extract_strided_slice %19 {offsets = [0, 0, 2], sizes = [2, 16, 14], strides = [1, 1, 1]} : vector<2x16x16xf32> to vector<2x16x14xf32>
    %41 = arith.subf %39, %40 : vector<2x16x14xf32>
    %42 = vector.extract_strided_slice %38 {offsets = [0, 0, 0], sizes = [2, 16, 14], strides = [1, 1, 1]} : vector<2x16x16xf32> to vector<2x16x14xf32>
    %43 = vector.extract_strided_slice %38 {offsets = [0, 0, 2], sizes = [2, 16, 14], strides = [1, 1, 1]} : vector<2x16x16xf32> to vector<2x16x14xf32>
    %44 = arith.subf %42, %43 : vector<2x16x14xf32>
    %45 = math.absf %41 : vector<2x16x14xf32>
    %46 = math.absf %44 : vector<2x16x14xf32>
    %47 = arith.subf %45, %46 : vector<2x16x14xf32>
    %48 = arith.mulf %47, %47 : vector<2x16x14xf32>
    %cst_29 = arith.constant dense<0.000000e+00> : vector<2x16xf32>
    %49 = vector.multi_reduction <add>, %48, %cst_29 [2] : vector<2x16x14xf32> to vector<2x16xf32>
    %50 = vector.shape_cast %49 : vector<2x16xf32> to vector<2x16x1xf32>
    %cst_30 = arith.constant dense<0.000000e+00> : vector<2x1xf32>
    %51 = vector.multi_reduction <add>, %50, %cst_30 [1] : vector<2x16x1xf32> to vector<2x1xf32>
    %52 = vector.shape_cast %51 : vector<2x1xf32> to vector<2x1x1xf32>
    %53 = vector.extract_strided_slice %19 {offsets = [0, 0, 1], sizes = [2, 16, 1], strides = [1, 1, 1]} : vector<2x16x16xf32> to vector<2x16x1xf32>
    %54 = vector.extract_strided_slice %38 {offsets = [0, 0, 1], sizes = [2, 16, 1], strides = [1, 1, 1]} : vector<2x16x16xf32> to vector<2x16x1xf32>
    %55 = math.absf %53 : vector<2x16x1xf32>
    %56 = math.absf %54 : vector<2x16x1xf32>
    %57 = arith.subf %55, %56 : vector<2x16x1xf32>
    %58 = arith.mulf %57, %57 : vector<2x16x1xf32>
    %cst_31 = arith.constant dense<0.000000e+00> : vector<2x16xf32>
    %59 = vector.multi_reduction <add>, %58, %cst_31 [2] : vector<2x16x1xf32> to vector<2x16xf32>
    %60 = vector.shape_cast %59 : vector<2x16xf32> to vector<2x16x1xf32>
    %cst_32 = arith.constant dense<0.000000e+00> : vector<2x1xf32>
    %61 = vector.multi_reduction <add>, %60, %cst_32 [1] : vector<2x16x1xf32> to vector<2x1xf32>
    %62 = vector.shape_cast %61 : vector<2x1xf32> to vector<2x1x1xf32>
    %63 = arith.addf %52, %62 : vector<2x1x1xf32>
    %64 = vector.extract_strided_slice %19 {offsets = [0, 0, 14], sizes = [2, 16, 1], strides = [1, 1, 1]} : vector<2x16x16xf32> to vector<2x16x1xf32>
    %65 = vector.extract_strided_slice %38 {offsets = [0, 0, 14], sizes = [2, 16, 1], strides = [1, 1, 1]} : vector<2x16x16xf32> to vector<2x16x1xf32>
    %66 = math.absf %64 : vector<2x16x1xf32>
    %67 = math.absf %65 : vector<2x16x1xf32>
    %68 = arith.subf %66, %67 : vector<2x16x1xf32>
    %69 = arith.mulf %68, %68 : vector<2x16x1xf32>
    %cst_33 = arith.constant dense<0.000000e+00> : vector<2x16xf32>
    %70 = vector.multi_reduction <add>, %69, %cst_33 [2] : vector<2x16x1xf32> to vector<2x16xf32>
    %71 = vector.shape_cast %70 : vector<2x16xf32> to vector<2x16x1xf32>
    %cst_34 = arith.constant dense<0.000000e+00> : vector<2x1xf32>
    %72 = vector.multi_reduction <add>, %71, %cst_34 [1] : vector<2x16x1xf32> to vector<2x1xf32>
    %73 = vector.shape_cast %72 : vector<2x1xf32> to vector<2x1x1xf32>
    %74 = arith.addf %63, %73 : vector<2x1x1xf32>
    %c0_35 = arith.constant 0 : index
    %c0_36 = arith.constant 0 : index
    %c0_37 = arith.constant 0 : index
    %75 = vector.load %arg3[%c0_35, %c0_36, %c0_37] : memref<2x1x1xf32, #tpu.memory_space<vmem>>, vector<2x1x1xf32>
    tpu.vector_store %arg3[%c0_35, %c0_36, %c0_37], %74 {strides = array<i32>} : memref<2x1x1xf32, #tpu.memory_space<vmem>>, vector<2x1x1xf32>,
    return
  }
  func.func @transform_0(%arg0: i32) -> (i32, i32, i32, i32) {
    %c0_i32 = arith.constant 0 : i32
    %c0_i32_0 = arith.constant 0 : i32
    %c0_i32_1 = arith.constant 0 : i32
    %c0_i32_2 = arith.constant 0 : i32
    return %arg0, %c0_i32, %c0_i32_0, %c0_i32_1 : i32, i32, i32, i32
  }
  func.func @transform_1(%arg0: i32) -> (i32, i32, i32, i32) {
    %c0_i32 = arith.constant 0 : i32
    %c0_i32_0 = arith.constant 0 : i32
    %c0_i32_1 = arith.constant 0 : i32
    %c0_i32_2 = arith.constant 0 : i32
    return %arg0, %c0_i32, %c0_i32_0, %c0_i32_1 : i32, i32, i32, i32
  }
  func.func @transform_2(%arg0: i32) -> (i32, i32, i32) {
    %c0_i32 = arith.constant 0 : i32
    %c0_i32_0 = arith.constant 0 : i32
    %c0_i32_1 = arith.constant 0 : i32
    return %arg0, %c0_i32, %c0_i32_0 : i32, i32, i32
  }
}

</mosaic_0001>

<bundles_post_ra>
// kernel: gradient_loss.1
= control target key start
LH: loop header
LB: loop body
LE: loop exit
PB: predicated region body
PF: predicated region fallthrough
CT: control target
= control target key end

     0   :  { %7 = vsyncpa [#allocation5], 0  ;;  %s545_s0 = inlined_call_operand.hbm [shape: f32[2,3,16,16], index: 0, kind: input, shape index: {}]   ;;  %s546_s1 = inlined_call_operand.hbm [shape: f32[2,3,16,16], index: 1, kind: input, shape index: {}]   ;;  %s547_s2 = inlined_call_operand.vmem [shape: f32[2,1,1], index: 2, kind: output, shape index: {}]  }
   0x1   :  { %8 = vsyncpa [#allocation7], 0  ;;  %s429_s9 = smov [#allocation4]   ;;  %s381_s13 = scalar_lea.hbm %s545_s0, 1536 }
   0x2   :  { %s14_s10 = sshll.u32 %s429_s9, 4  ;;  %p382_p0 = scmp.ne.s32.totalorder %s545_s0, %s381_s13  ;;  %s15_s10 = int_to_ptr.vmem [resolvable:$true] %s14_s10 }
   0x3   :  { %p385_p1 = scmp.lt.u32.totalorder %s381_s13, %s545_s0 }
   0x5   :  { %p387_p2 = pnand %p385_p1, %p382_p0 }
   0x7   :  { %390 = shalt.err (!%p387_p2)
}
   0x8   :  { %s391_s18 = scalar_lea.vmem %s15_s10, 1536  ;;  %p396_p4 = scmp.lt.s32.totalorder %s15_s10, %s15_s10 }
   0x9   :  { %p392_p3 = scmp.ne.s32.totalorder %s15_s10, %s391_s18  ;;  %p397_p5 = scmp.lt.s32.totalorder %s391_s18, %s391_s18 }
   0xb   :  { %p398_p6 = por %p397_p5, %p396_p4 }
   0xd   :  { %p399_p7 = pnand %p398_p6, %p392_p3 }
   0xf   :  { %402 = shalt.err (!%p399_p7)
}
  0x10   :  { %s430_s19 = smov 128   ;;  %s431_s20 = smov 8  }
  0x11   :  { %20 = dma.hbm_to_vmem [thread:$0]  %s545_s0, 1536, %s15_s10, [#allocation5], %s430_s19, %s430_s19, %s431_s20  }
  0x12   :  { %s432_s23 = smov [#allocation6]   ;;  %s403_s27 = scalar_lea.hbm %s546_s1, 1536 }
  0x13   :  { %s26_s24 = sshll.u32 %s432_s23, 4  ;;  %p404_p8 = scmp.ne.s32.totalorder %s546_s1, %s403_s27  ;;  %s27_s24 = int_to_ptr.vmem [resolvable:$true] %s26_s24 }
  0x14   :  { %p407_p9 = scmp.lt.u32.totalorder %s403_s27, %s546_s1 }
  0x16   :  { %p409_p10 = pnand %p407_p9, %p404_p8 }
  0x18   :  { %412 = shalt.err (!%p409_p10)
}
  0x19   :  { %s413_s4 = scalar_lea.vmem %s27_s24, 1536  ;;  %p418_p12 = scmp.lt.s32.totalorder %s27_s24, %s27_s24 }
  0x1a   :  { %p414_p11 = scmp.ne.s32.totalorder %s27_s24, %s413_s4  ;;  %p419_p13 = scmp.lt.s32.totalorder %s413_s4, %s413_s4 }
  0x1c   :  { %p420_p0 = por %p419_p13, %p418_p12 }
  0x1e   :  { %p421_p1 = pnand %p420_p0, %p414_p11 }
  0x20   :  { %424 = shalt.err (!%p421_p1)
}
  0x21   :  { %32 = dma.hbm_to_vmem [thread:$0]  %s546_s1, 1536, %s27_s24, [#allocation7], %s430_s19, %s430_s19, %s431_s20  }
  0x22   :  { %425 = dma.done.wait [#allocation5], 1536  }
  0x23   :  { %426 = vsyncadd [#allocation5], 4294965760 }
  0x24   :  { %427 = dma.done.wait [#allocation7], 1536  }
  0x25   :  { %428 = vsyncadd [#allocation7], 4294965760  ;;  %vm59_vm0 = vcmask 122880   ;;  %v433_v0 = vmov 0.0   ;;  %v45_v1 = vld [vmem:[#allocation4 + $0x30] sm:$0xff]  ;;  %v46_v2 = vld [vmem:[#allocation4 + $0x38] sm:$0xff] }
  0x26   :  { %61 = vst.msk [vmem:[#allocation2 + $0x18] sm:$0x1] %vm59_vm0, %v433_v0  ;;  %60 = vst.msk [vmem:[#allocation2] sm:$0x1] %vm59_vm0, %v433_v0  ;;  %v47_v3 = vld [vmem:[#allocation4 + $0x40] sm:$0xff]  ;;  %v48_v4 = vld [vmem:[#allocation4 + $0x48] sm:$0xff] }
  0x27   :  { %67 = vst.msk [vmem:[#allocation2 + $0x11] sm:$0x1] %vm59_vm0, %v433_v0  ;;  %68 = vst.msk [vmem:[#allocation2 + $0x29] sm:$0x1] %vm59_vm0, %v433_v0  ;;  %v49_v5 = vld [vmem:[#allocation4 + $0x50] sm:$0xff]  ;;  %v50_v6 = vld [vmem:[#allocation4 + $0x58] sm:$0xff]  ;;  %v53_v7 = vadd.f32 %v47_v3, %v45_v1  ;;  %v54_v8 = vadd.f32 %v48_v4, %v46_v2 }
  0x28   :  { %143 = vst.msk [vmem:[#allocation3] sm:$0x1] %vm59_vm0, %v433_v0  ;;  %144 = vst.msk [vmem:[#allocation3 + $0x18] sm:$0x1] %vm59_vm0, %v433_v0  ;;  %vm62_vm1 = vcmask 130048   ;;  %v39_v9 = vld [vmem:[#allocation4] sm:$0xff] }
  0x29   :  { %149 = vst.msk [vmem:[#allocation3 + $0x11] sm:$0x1] %vm59_vm0, %v433_v0  ;;  %150 = vst.msk [vmem:[#allocation3 + $0x29] sm:$0x1] %vm59_vm0, %v433_v0  ;;  %v40_v10 = vld [vmem:[#allocation4 + $0x8] sm:$0xff]  ;;  %v41_v11 = vld [vmem:[#allocation4 + $0x10] sm:$0xff]  ;;  %v57_v12 = vadd.f32 %v53_v7, %v49_v5  ;;  %v58_v17 = vadd.f32 %v54_v8, %v50_v6 }
  0x2a   :  { %v42_v13 = vld [vmem:[#allocation4 + $0x18] sm:$0xff]  ;;  %v43_v14 = vld [vmem:[#allocation4 + $0x20] sm:$0xff]  ;;  %v44_v15 = vld [vmem:[#allocation4 + $0x28] sm:$0xff]  ;;  %v51_v16 = vadd.f32 %v41_v11, %v39_v9  ;;  %vm81_vm2 = vcmask 1046528   ;;  %vm104_vm3 = vcmask 1045504   ;;  %s434_s1 = smov 126  }
  0x2b   :  { %v52_v18 = vadd.f32 %v42_v13, %v40_v10  ;;  %v123_v19 = vld [vmem:[#allocation6] sm:$0xff]  ;;  %v124_v20 = vld [vmem:[#allocation6 + $0x8] sm:$0xff]  ;;  %v125_v21 = vld [vmem:[#allocation6 + $0x10] sm:$0xff]  ;;  %65 = vst.msk [vmem:[#allocation2 + $0x19] sm:$0xff] %vm62_vm1, %v57_v12  ;;  %vm327_vm4 = vcmask 121968   ;;  %vm259_vm5 = vcmask 113664  }
  0x2c   :  { %v55_v22 = vadd.f32 %v51_v16, %v43_v14  ;;  %v126_v23 = vld [vmem:[#allocation6 + $0x18] sm:$0xff]  ;;  %v127_v24 = vld [vmem:[#allocation6 + $0x20] sm:$0xff]  ;;  %v128_v25 = vld [vmem:[#allocation6 + $0x28] sm:$0xff]  ;;  %v135_v26 = vadd.f32 %v125_v21, %v123_v19  ;;  %66 = vst.msk [vmem:[#allocation2 + $0x21] sm:$0xff] %vm62_vm1, %v58_v17  ;;  %s435_s6 = smov 115   ;;  %vm306_vm6 = vcmask 15368  }
  0x2d   :  { %v56_v27 = vadd.f32 %v52_v18, %v44_v15  ;;  %v136_v28 = vadd.f32 %v126_v23, %v124_v20  ;;  %v129_v29 = vld [vmem:[#allocation6 + $0x30] sm:$0xff]  ;;  %v130_v30 = vld [vmem:[#allocation6 + $0x38] sm:$0xff]  ;;  %v131_v31 = vld [vmem:[#allocation6 + $0x40] sm:$0xff]  ;;  %s436_s7 = smov 127   ;;  %vm364_vm7 = vcmask 0  }
  0x2e   :  { %63 = vst.msk [vmem:[#allocation2 + $0x1] sm:$0xff] %vm62_vm1, %v55_v22  ;;  %v139_v32 = vadd.f32 %v135_v26, %v127_v24  ;;  %v132_v33 = vld [vmem:[#allocation6 + $0x48] sm:$0xff]  ;;  %v133_v34 = vld [vmem:[#allocation6 + $0x50] sm:$0xff]  ;;  %v134_v35 = vld [vmem:[#allocation6 + $0x58] sm:$0xff]  ;;  %v137_v36 = vadd.f32 %v131_v31, %v129_v29 }
  0x2f   :  { %64 = vst.msk [vmem:[#allocation2 + $0x9] sm:$0xff] %vm62_vm1, %v56_v27  ;;  %v140_v37 = vadd.f32 %v136_v28, %v128_v25  ;;  %v138_v38 = vadd.f32 %v132_v33, %v130_v30 }
  0x30   :  { %145 = vst.msk [vmem:[#allocation3 + $0x1] sm:$0xff] %vm62_vm1, %v139_v32  ;;  %v141_v39 = vadd.f32 %v137_v36, %v133_v34 }
  0x31   :  { %146 = vst.msk [vmem:[#allocation3 + $0x9] sm:$0xff] %vm62_vm1, %v140_v37  ;;  %v142_v40 = vadd.f32 %v138_v38, %v134_v35 }
  0x32   :  { %147 = vst.msk [vmem:[#allocation3 + $0x19] sm:$0xff] %vm62_vm1, %v141_v39  ;;  %v72_v41 = vld [vmem:[#allocation2 + $0x18] sm:$0xff] }
  0x33   :  { %148 = vst.msk [vmem:[#allocation3 + $0x21] sm:$0xff] %vm62_vm1, %v142_v40  ;;  %v73_v42 = vld [vmem:[#allocation2 + $0x20] sm:$0xff]  ;;  %v87_v43 = vrot.slane %v72_v41, 1  ;;  %v110_v44 = vrot.slane %v72_v41, 2  ;;  %v74_v45 = vld [vmem:[#allocation2 + $0x28] sm:$0x3] }
  0x34   :  { %v88_v46 = vrot.slane %v73_v42, 1  ;;  %v111_v47 = vrot.slane %v73_v42, 2  ;;  %v90_v49 = vrot.slane %v74_v45, 1  ;;  %v113_v50 = vrot.slane %v74_v45, 2 }
  0x35   :  { %v69_v48 = vld [vmem:[#allocation2] sm:$0xff] }
  0x36   :  { %v70_v51 = vld [vmem:[#allocation2 + $0x8] sm:$0xff]  ;;  %v82_v52 = vrot.slane %v69_v48, 1  ;;  %v71_v53 = vld [vmem:[#allocation2 + $0x10] sm:$0x3]  ;;  %v89_v54 = vsel %vm81_vm2, %v87_v43, %v88_v46  ;;  %v105_v56 = vrot.slane %v69_v48, 2  ;;  %v112_v59 = vsel %vm104_vm3, %v110_v44, %v111_v47 }
  0x37   :  { %v83_v55 = vrot.slane %v70_v51, 1  ;;  %v106_v57 = vrot.slane %v70_v51, 2  ;;  %v98_v58 = vadd.f32 %v89_v54, %v72_v41  ;;  %v91_v60 = vsel %vm81_vm2, %v88_v46, %v90_v49  ;;  %v151_v8 = vld [vmem:[#allocation3] sm:$0xff] }
  0x38   :  { %v85_v61 = vrot.slane %v71_v53, 1  ;;  %v152_v62 = vld [vmem:[#allocation3 + $0x8] sm:$0xff]  ;;  %v153_v63 = vld [vmem:[#allocation3 + $0x10] sm:$0x3]  ;;  %v99_v1 = vadd.f32 %v91_v60, %v73_v42  ;;  %v114_v2 = vsel %vm104_vm3, %v111_v47, %v113_v50  ;;  %v108_v3 = vrot.slane %v71_v53, 2 }
  0x39   :  { %v84_v0 = vsel %vm81_vm2, %v82_v52, %v83_v55  ;;  %v102_v4 = vadd.f32 %v98_v58, %v89_v54  ;;  %v164_v7 = vrot.slane %v152_v62, 1  ;;  %v107_v9 = vsel %vm104_vm3, %v105_v56, %v106_v57  ;;  %v154_v29 = vld [vmem:[#allocation3 + $0x18] sm:$0xff] }
  0x3a   :  { %v96_v5 = vadd.f32 %v84_v0, %v69_v48  ;;  %v86_v6 = vsel %vm81_vm2, %v83_v55, %v85_v61  ;;  %v103_v10 = vadd.f32 %v99_v1, %v91_v60  ;;  %v166_v12 = vrot.slane %v153_v63, 1  ;;  %v155_v21 = vld [vmem:[#allocation3 + $0x20] sm:$0xff]  ;;  %v156_v25 = vld [vmem:[#allocation3 + $0x28] sm:$0x3] }
  0x3b   :  { %v97_v11 = vadd.f32 %v86_v6, %v70_v51  ;;  %v491_v13 = vadd.f32 %v112_v59, %v102_v4  ;;  %v186_v15 = vrot.slane %v152_v62, 2  ;;  %v188_v16 = vrot.slane %v153_v63, 2 }
  0x3c   :  { %v100_v14 = vadd.f32 %v96_v5, %v84_v0  ;;  %v109_v18 = vsel %vm104_vm3, %v106_v57, %v108_v3  ;;  %v167_v19 = vsel %vm81_vm2, %v164_v7, %v166_v12  ;;  %v163_v20 = vrot.slane %v151_v8, 1 }
  0x3d   :  { %v101_v17 = vadd.f32 %v97_v11, %v86_v6  ;;  %211 = vrot.lane.b32.xlu1 %v491_v13, %s434_s1  ;;  %v499_v23 = vadd.f32 %v114_v2, %v103_v10  ;;  %v178_v24 = vadd.f32 %v167_v19, %v152_v62  ;;  %v189_v26 = vsel %vm104_vm3, %v186_v15, %v188_v16 }
  0x3e   :  { %v497_v22 = vadd.f32 %v107_v9, %v100_v14  ;;  %v165_v27 = vsel %vm81_vm2, %v163_v20, %v164_v7  ;;  %v185_v28 = vrot.slane %v151_v8, 2  ;;  %v169_v33 = vrot.slane %v155_v21, 1 }
  0x3f   :  { %v120_v30 = vadd.f32 %v109_v18, %v101_v17  ;;  %v182_v31 = vadd.f32 %v178_v24, %v167_v19  ;;  %v177_v32 = vadd.f32 %v165_v27, %v151_v8  ;;  %v171_v35 = vrot.slane %v156_v25, 1 }
  0x40   :  { %207 = vrot.lane.b32.xlu0 %v497_v22, %s434_s1  ;;  %v187_v34 = vsel %vm104_vm3, %v185_v28, %v186_v15  ;;  %v191_v36 = vrot.slane %v155_v21, 2  ;;  %v193_v39 = vrot.slane %v156_v25, 2  ;;  %v168_v40 = vrot.slane %v154_v29, 1 }
  0x41   :  { %213 = vrot.lane.b32.xlu1 %v499_v23, %s434_s1  ;;  %v200_v37 = vadd.f32 %v189_v26, %v182_v31  ;;  %v181_v38 = vadd.f32 %v177_v32, %v165_v27  ;;  %v172_v41 = vsel %vm81_vm2, %v169_v33, %v171_v35  ;;  %v190_v42 = vrot.slane %v154_v29, 2 }
  0x42   :  { %v180_v44 = vadd.f32 %v172_v41, %v155_v21  ;;  %v194_v45 = vsel %vm104_vm3, %v191_v36, %v193_v39  ;;  %v170_v46 = vsel %vm81_vm2, %v168_v40, %v169_v33  ;;  %v286_v53 = vand.u32 2147483647, %v497_v22 }
  0x43   :  { %v199_v43 = vadd.f32 %v187_v34, %v181_v38  ;;  %v179_v48 = vadd.f32 %v170_v46, %v154_v29  ;;  %v192_v49 = vsel %vm104_vm3, %v190_v42, %v191_v36  ;;  %v287_v54 = vand.u32 2147483647, %v120_v30 }
  0x44   :  { %209 = vrot.lane.b32.xlu0 %v120_v30, %s434_s1  ;;  %v184_v47 = vadd.f32 %v180_v44, %v172_v41  ;;  %v291_v55 = vand.u32 2147483647, %v200_v37  ;;  %v288_v2 = vand.u32 2147483647, %v491_v13  ;;  %v289_v3 = vand.u32 2147483647, %v499_v23 }
  0x45   :  { %229 = vrot.lane.b32.xlu1 %v200_v37, %s434_s1  ;;  %v183_v51 = vadd.f32 %v179_v48, %v170_v46  ;;  %v290_v56 = vand.u32 2147483647, %v199_v43 }
  0x46   :  { %v202_v50 = vadd.f32 %v194_v45, %v184_v47  ;;  %v295_v57 = vsub.f32 %v287_v54, %v291_v55 }
  0x47   :  { %v201_v52 = vadd.f32 %v192_v49, %v183_v51  ;;  %v294_v58 = vsub.f32 %v286_v53, %v290_v56 }
  0x48   :  { %227 = vrot.lane.b32.xlu0 %v199_v43, %s434_s1  ;;  %v518_v59 = vmul.f32 %v295_v57, %v295_v57  ;;  %v293_v4 = vand.u32 2147483647, %v202_v50 }
  0x49   :  { %233 = vrot.lane.b32.xlu1 %v202_v50, %s434_s1  ;;  %v520_v60 = vmul.f32 %v294_v58, %v294_v58  ;;  %v292_v5 = vand.u32 2147483647, %v201_v52 }
  0x4a   :  { %v329_v0 = vsel %vm327_vm4, %v518_v59, 0.0  ;;  %v297_v12 = vsub.f32 %v289_v3, %v293_v4 }
  0x4b   :  { %v328_v63 = vsel %vm327_vm4, %v520_v60, 0.0  ;;  %v296_v14 = vsub.f32 %v288_v2, %v292_v5 }
  0x4c   :  { %231 = vrot.lane.b32.xlu0 %v201_v52, %s434_s1  ;;  %v330_v7 = vadd.f32 %v329_v0, %v328_v63  ;;  %v301_v29 = vmul.f32 %v297_v12, %v297_v12 }
  0x4e   :  { %v331_v16 = vrot.slane %v330_v7, 4  ;;  %v338_v40 = vsel %vm327_vm4, %v301_v29, 0.0  ;;  %v317_v2 = vsel %vm306_vm6, %v301_v29, 0.0 }
  0x50   :  { %v332_v31 = vadd.f32 %v331_v16, %v330_v7 }
  0x52   :  { %v333_v44 = vrot.slane %v332_v31, 2 }
  0x54   :  { %v334_v49 = vadd.f32 %v333_v44, %v332_v31 }
  0xaf   :  { %v212_v61 = vpop.permute.xlu1 %211 }
  0xb0   :  { %v221_v20 = vsub.f32 %v491_v13, %v212_v61  ;;  %v308_v61 = vsel %vm306_vm6, %v518_v59, 0.0 }
  0xb2   :  { %v208_v62 = vpop.permute.xlu0 %207  ;;  %v245_v36 = vand.u32 2147483647, %v221_v20 }
  0xb3   :  { %v214_v1 = vpop.permute.xlu1 %213  ;;  %v219_v9 = vsub.f32 %v497_v22, %v208_v62  ;;  %v300_v22 = vmul.f32 %v296_v14, %v296_v14  ;;  %v307_v62 = vsel %vm306_vm6, %v520_v60, 0.0 }
  0xb4   :  { %v222_v25 = vsub.f32 %v499_v23, %v214_v1  ;;  %v309_v63 = vadd.f32 %v308_v61, %v307_v62 }
  0xb5   :  { %v243_v21 = vand.u32 2147483647, %v219_v9  ;;  %v337_v23 = vsel %vm327_vm4, %v300_v22, 0.0  ;;  %v316_v1 = vsel %vm306_vm6, %v300_v22, 0.0 }
  0xb6   :  { %v210_v6 = vpop.permute.xlu0 %209  ;;  %v339_v46 = vadd.f32 %v338_v40, %v337_v23  ;;  %v310_v0 = vrot.slane %v309_v63, 4  ;;  %v318_v4 = vadd.f32 %v317_v2, %v316_v1 }
  0xb7   :  { %v220_v8 = vsub.f32 %v120_v30, %v210_v6  ;;  %v230_v10 = vpop.permute.xlu1 %229 }
  0xb8   :  { %v240_v11 = vsub.f32 %v200_v37, %v230_v10  ;;  %v246_v37 = vand.u32 2147483647, %v222_v25  ;;  %v311_v3 = vadd.f32 %v310_v0, %v309_v63  ;;  %v319_v7 = vrot.slane %v318_v4, 4 }
  0xb9   :  { %v244_v17 = vand.u32 2147483647, %v220_v8 }
  0xba   :  { %v228_v15 = vpop.permute.xlu0 %227  ;;  %v248_v18 = vand.u32 2147483647, %v240_v11  ;;  %v312_v6 = vrot.slane %v311_v3, 2  ;;  %v320_v12 = vadd.f32 %v319_v7, %v318_v4 }
  0xbb   :  { %v239_v19 = vsub.f32 %v199_v43, %v228_v15  ;;  %v234_v24 = vpop.permute.xlu1 %233 }
  0xbc   :  { %v242_v27 = vsub.f32 %v202_v50, %v234_v24  ;;  %v252_v28 = vsub.f32 %v244_v17, %v248_v18  ;;  %v340_v50 = vrot.slane %v339_v46, 4  ;;  %v313_v11 = vadd.f32 %v312_v6, %v311_v3 }
  0xbd   :  { %v247_v26 = vand.u32 2147483647, %v239_v19  ;;  %v321_v17 = vrot.slane %v320_v12, 2 }
  0xbe   :  { %v232_v30 = vpop.permute.xlu0 %231  ;;  %v250_v32 = vand.u32 2147483647, %v242_v27  ;;  %v256_v34 = vmul.f32 %v252_v28, %v252_v28  ;;  %v341_v53 = vadd.f32 %v340_v50, %v339_v46  ;;  %v314_v59 = vrot.slane %v313_v11, 1 }
  0xbf   :  { %v241_v33 = vsub.f32 %v201_v52, %v232_v30  ;;  %v251_v35 = vsub.f32 %v243_v21, %v247_v26  ;;  %v335_v52 = vrot.slane %v334_v49, 1  ;;  %v322_v25 = vadd.f32 %v321_v17, %v320_v12 }
  0xc0   :  { %v263_v13 = vsel %vm259_vm5, %v256_v34, 0.0  ;;  %v254_v43 = vsub.f32 %v246_v37, %v250_v32  ;;  %v342_v55 = vrot.slane %v341_v53, 2  ;;  %v315_v24 = vadd.f32 %v314_v59, %v313_v11 }
  0xc1   :  { %v249_v38 = vand.u32 2147483647, %v241_v33  ;;  %v255_v39 = vmul.f32 %v251_v35, %v251_v35  ;;  %264 = vadd.xlane.f32.xlu1 %v263_v13  ;;  %v336_v54 = vadd.f32 %v335_v52, %v334_v49  ;;  %v323_v30 = vrot.slane %v322_v25, 1 }
  0xc2   :  { %v258_v48 = vmul.f32 %v254_v43, %v254_v43  ;;  %v343_v56 = vadd.f32 %v342_v55, %v341_v53 }
  0xc3   :  { %v260_v41 = vsel %vm259_vm5, %v255_v39, 0.0  ;;  %v253_v42 = vsub.f32 %v245_v36, %v249_v38  ;;  %v324_v34 = vadd.f32 %v323_v30, %v322_v25 }
  0xc4   :  { %261 = vadd.xlane.f32.xlu0 %v260_v41  ;;  %v269_v51 = vsel %vm259_vm5, %v258_v48, 0.0  ;;  %v344_v57 = vrot.slane %v343_v56, 1 }
  0xc5   :  { %v257_v45 = vmul.f32 %v253_v42, %v253_v42 }
  0xc6   :  { %v345_v58 = vadd.f32 %v344_v57, %v343_v56 }
  0xc7   :  { %v266_v47 = vsel %vm259_vm5, %v257_v45, 0.0 }
  0xc8   :  { %267 = vadd.xlane.f32.xlu0 %v266_v47 }
  0xcc   :  { %270 = vadd.xlane.f32.xlu0 %v269_v51 }
  0xd2   :  { %348 = vrot.lane.b32.xlu1 %v336_v54, %s435_s6 }
  0xe2   :  { %350 = vrot.lane.b32.xlu0 %v345_v58, %s435_s6 }
 0x14e   :  { %v265_v5 = vpop.xlane.xlu1 %264 }
 0x151   :  { %v262_v8 = vpop.xlane.xlu0 %261 }
 0x152   :  { %v272_v9 = vadd.f32 %v265_v5, %v262_v8  ;;  %v349_v28 = vpop.permute.xlu1 %348 }
 0x154   :  { %v273_v10 = vrot.slane %v272_v9, 4 }
 0x155   :  { %v268_v14 = vpop.xlane.xlu0 %267 }
 0x156   :  { %v274_v15 = vadd.f32 %v273_v10, %v272_v9 }
 0x158   :  { %v275_v16 = vrot.slane %v274_v15, 2 }
 0x159   :  { %v271_v60 = vpop.xlane.xlu0 %270 }
 0x15a   :  { %v276_v18 = vadd.f32 %v275_v16, %v274_v15  ;;  %v279_v19 = vadd.f32 %v271_v60, %v268_v14 }
 0x15c   :  { %v280_v20 = vrot.slane %v279_v19, 4  ;;  %v277_v21 = vrot.slane %v276_v18, 1 }
 0x15d   :  { %v351_v36 = vpop.permute.xlu0 %350 }
 0x15e   :  { %v281_v26 = vadd.f32 %v280_v20, %v279_v19  ;;  %v278_v27 = vadd.f32 %v277_v21, %v276_v18 }
 0x160   :  { %v282_v29 = vrot.slane %v281_v26, 2  ;;  %v325_v22 = vadd.f32 %v315_v24, %v278_v27 }
 0x162   :  { %v283_v31 = vadd.f32 %v282_v29, %v281_v26  ;;  %v354_v32 = vadd.f32 %v349_v28, %v325_v22 }
 0x164   :  { %358 = vrot.lane.b32.xlu1 %v354_v32, %s436_s7  ;;  %v284_v33 = vrot.slane %v283_v31, 1 }
 0x166   :  { %v285_v35 = vadd.f32 %v284_v33, %v283_v31 }
 0x168   :  { %v326_v37 = vadd.f32 %v324_v34, %v285_v35 }
 0x16a   :  { %v355_v38 = vadd.f32 %v351_v36, %v326_v37 }
 0x16c   :  { %360 = vrot.lane.b32.xlu1 %v355_v38, %s436_s7 }
 0x1d6   :  { %v359_v13 = vpop.permute.xlu1 %358 }
 0x1d7   :  { %365 = vst.msk [vmem:[%s547_s2] sm:$0x1] %vm364_vm7, %v359_v13 }
 0x1de   :  { %v361_v39 = vpop.permute.xlu1 %360 }
 0x1df   :  { %366 = vst.msk [vmem:[%s547_s2 + $0x1] sm:$0x1] %vm364_vm7, %v361_v39 }
 0x1e0   :  { %371 = vsyncpa [#allocation5], 1 }
 0x1e1   :  { %372 = vsyncpa [#allocation7], 1 }

</bundles_post_ra>
